<compile_context>
chip_gen: v6e
topology: v6e:2x2x1
jax: 0.10.0
libtpu: 0.0.40
codegen_flags: <defaults>
</compile_context>

<pallas_src>
import math
import functools

import jax
import jax.numpy as jnp
from jax.experimental import pallas as pl
from jax.experimental.pallas import tpu as pltpu


# ----------------------------- kernels ---------------------------------------


def _pe_add_kernel(x_ref, pe_ref, o_ref, *, batch):
    """Eval path: x + pe broadcast over batch. x_ref/o_ref: (tile, B*D), pe_ref: (tile, D)."""
    pe_row = jnp.tile(pe_ref[...], (1, batch))          # (tile, B*D), matches [b-major, d] layout
    o_ref[...] = (x_ref[...] + pe_row).astype(o_ref.dtype)


def _pe_add_dropout_kernel(x_ref, pe_ref, bits_ref, o_ref, *,
                           batch, keep_threshold, keep_scale):
    """Training path: (x + pe) with inverted dropout. bits_ref: uint32 (tile, B*D)."""
    pe_row = jnp.tile(pe_ref[...], (1, batch))
    y = x_ref[...] + pe_row
    # drop with probability p:  P(bits < round(p * 2^32)) ≈ p  -> keep when bits >= threshold
    keep = bits_ref[...] >= jnp.uint32(keep_threshold)
    y = jnp.where(keep, y * jnp.asarray(keep_scale, y.dtype), jnp.zeros_like(y))
    o_ref[...] = y.astype(o_ref.dtype)


# ----------------------------- pe table --------------------------------------


def make_positional_encoding_table(d_model: int, max_len: int = 5000, dtype=jnp.float32):
    """Deterministic construction of the `pe` buffer (matches the torch __init__), shape [max_len, d_model]."""
    assert d_model % 2 == 0, "d_model must be even (same assumption as the torch module's sin/cos split)"
    position = jnp.arange(max_len, dtype=jnp.float32)[:, None]                  # [max_len, 1]
    div_term = jnp.exp(
        jnp.arange(0, d_model, 2, dtype=jnp.float32) * (-math.log(10000.0) / d_model)
    )                                                                            # [d_model/2]
    pe = jnp.zeros((max_len, d_model), dtype=jnp.float32)
    pe = pe.at[:, 0::2].set(jnp.sin(position * div_term))
    pe = pe.at[:, 1::2].set(jnp.cos(position * div_term))
    return pe.astype(dtype)


# ----------------------------- wrapper ----------------------------------------


def _choose_seq_tile(S: int, row_bytes: int, target_block_bytes: int) -> int:
    """Rows per block: ~target_block_bytes of x per block, multiple of 8, capped at S."""
    rows = max(8, (int(target_block_bytes // max(row_bytes, 1)) // 8) * 8)
    return S if rows >= S else rows


def positional_encoding(x, pe, *, dropout_p: float = 0.1, training: bool = False,
                        rng_key=None, seq_tile: int | None = None,
                        target_block_bytes: int = 2 << 20):
    """x: [S, B, D]. pe: [max_len, D]. Returns [S, B, D] (x + pe, then dropout if training)."""
    assert x.ndim == 3, "expected [seq_len, batch, d_model]"
    S, B, D = x.shape
    assert pe.ndim == 2 and pe.shape[1] == D and pe.shape[0] >= S

    # pe in x's dtype: halves pe traffic for bf16 activations, no in-kernel promotion.
    if pe.dtype != x.dtype:
        pe = pe.astype(x.dtype)

    BD = B * D
    x2 = x.reshape(S, BD)                       # free: row-major contiguous, lane-dense last dim
    row_bytes = BD * x2.dtype.itemsize

    if seq_tile is None:
        seq_tile = _choose_seq_tile(S, row_bytes, target_block_bytes)
    assert seq_tile % 8 == 0 or seq_tile == S, \
        "seq_tile must be a multiple of 8 (or equal to seq_len)"

    # Pass the full pe table (index_map selects the tile) unless the tile is an odd size,
    # in which case slice so the pe block equals the full array dims (Mosaic (8,128) rule).
    pe_used = pe if seq_tile % 8 == 0 else pe[:S]

    grid = (pl.cdiv(S, seq_tile),)
    x_spec = pl.BlockSpec((seq_tile, BD), lambda i: (i, 0))
    pe_spec = pl.BlockSpec((seq_tile, D), lambda i: (i, 0))
    out_spec = pl.BlockSpec((seq_tile, BD), lambda i: (i, 0))

    use_dropout = bool(training) and float(dropout_p) > 0.0
    if use_dropout:
        assert 0.0 <= dropout_p < 1.0

    # VMEM budget: double-buffered x-in, out, (bits), pe blocks + headroom.
    x_blk = seq_tile * row_bytes
    pe_blk = seq_tile * D * pe.dtype.itemsize
    bits_blk = seq_tile * BD * 4 if use_dropout else 0
    needed = 2 * (2 * x_blk + pe_blk + bits_blk) + (4 << 20)
    vmem_limit = int(min(max(needed, 32 << 20), 48 << 20))   # safe on v5e/v6e (128 MiB) and v7x (64 MiB)

    compiler_params = pltpu.CompilerParams(
        dimension_semantics=("parallel",),      # tiles independent -> shard across v7x's 2 TCs
        vmem_limit_bytes=vmem_limit,
    )

    if use_dropout:
        if rng_key is None:
            rng_key = jax.random.PRNGKey(0)
        bits = jax.random.bits(rng_key, (S, BD), dtype=jnp.uint32)
        keep_threshold = min(int(round(float(dropout_p) * 4294967296.0)), 4294967295)
        kernel = functools.partial(
            _pe_add_dropout_kernel, batch=B,
            keep_threshold=keep_threshold,
            keep_scale=1.0 / (1.0 - float(dropout_p)),
        )
        out2 = pl.pallas_call(
            kernel,
            out_shape=jax.ShapeDtypeStruct((S, BD), x.dtype),
            grid=grid,
            in_specs=[x_spec, pe_spec, x_spec],     # bits share x's block shape
            out_specs=out_spec,
            compiler_params=compiler_params,
        )(x2, pe_used, bits)
    else:
        kernel = functools.partial(_pe_add_kernel, batch=B)
        out2 = pl.pallas_call(
            kernel,
            out_shape=jax.ShapeDtypeStruct((S, BD), x.dtype),
            grid=grid,
            in_specs=[x_spec, pe_spec],
            out_specs=out_spec,
            compiler_params=compiler_params,
        )(x2, pe_used)

    return out2.reshape(S, B, D)


# ----------------------------- demo / check -----------------------------------


if __name__ == "__main__":
    key = jax.random.PRNGKey(0)
    S, B, D = 8, 2, 32                      # [seq_len, batch, d_model]
    kx, kdrop = jax.random.split(key)
    x = jax.random.normal(kx, (S, B, D), dtype=jnp.float32)

    pe = make_positional_encoding_table(D, max_len=5000)

    # Eval-mode forward (dropout is identity) — deterministic, verify against pure-JAX reference.
    out = positional_encoding(x, pe, dropout_p=0.1, training=False)
    jax.block_until_ready(out)
    ref = x + pe[:S][:, None, :]
    assert out.shape == (S, B, D) and out.dtype == x.dtype
    assert jnp.allclose(out, ref, atol=1e-6), "mismatch vs reference"

    # Training-mode forward (stochastic inverted dropout): every element must be either 0
    # or (x + pe) / (1 - p).
    p = 0.1
    out_tr = positional_encoding(x, pe, dropout_p=p, training=True, rng_key=kdrop)
    jax.block_until_ready(out_tr)
    assert out_tr.shape == (S, B, D)
    scaled = ref / (1.0 - p)
    ok = jnp.isclose(out_tr, 0.0) | jnp.isclose(out_tr, scaled, atol=1e-5)
    assert bool(jnp.all(ok)), "training output is not {0, scaled(x+pe)} elementwise"

    print("KERNEL_OK")
</pallas_src>

<mosaic_0001>
module attributes {stable_mosaic.version = 11 : i64} {
  func.func @_pe_add_kernel(%arg0: i32, %arg1: memref<8x64xf32, #tpu.memory_space<vmem>>, %arg2: memref<8x32xf32, #tpu.memory_space<vmem>>, %arg3: memref<8x64xf32, #tpu.memory_space<vmem>>) attributes {dimension_semantics = [#tpu.dimension_semantics<parallel>], iteration_bounds = array<i64: 1>, scalar_prefetch = 0 : i64, scratch_operands = 0 : i64, tpu.core_type = #tpu.core_type<tc>, window_params = [{transform_indices = @transform_0, window_bounds = array<i64: 8, 64>}, {transform_indices = @transform_1, window_bounds = array<i64: 8, 32>}, {transform_indices = @transform_2, window_bounds = array<i64: 8, 64>}]} {
    %c0 = arith.constant 0 : index
    %c0_0 = arith.constant 0 : index
    %0 = vector.load %arg2[%c0, %c0_0] : memref<8x32xf32, #tpu.memory_space<vmem>>, vector<8x32xf32>
    %1 = tpu.concatenate %0, %0 in 1 : vector<8x32xf32>, vector<8x32xf32> -> vector<8x64xf32>
    %c0_1 = arith.constant 0 : index
    %c0_2 = arith.constant 0 : index
    %2 = vector.load %arg1[%c0_1, %c0_2] : memref<8x64xf32, #tpu.memory_space<vmem>>, vector<8x64xf32>
    %3 = arith.addf %2, %1 : vector<8x64xf32>
    %c0_3 = arith.constant 0 : index
    %c0_4 = arith.constant 0 : index
    %4 = vector.load %arg3[%c0_3, %c0_4] : memref<8x64xf32, #tpu.memory_space<vmem>>, vector<8x64xf32>
    tpu.vector_store %arg3[%c0_3, %c0_4], %3 {strides = array<i32>} : memref<8x64xf32, #tpu.memory_space<vmem>>, vector<8x64xf32>,
    return
  }
  func.func @transform_0(%arg0: i32) -> (i32, i32) {
    %c0_i32 = arith.constant 0 : i32
    %c0_i32_0 = arith.constant 0 : i32
    return %arg0, %c0_i32 : i32, i32
  }
  func.func @transform_1(%arg0: i32) -> (i32, i32) {
    %c0_i32 = arith.constant 0 : i32
    %c0_i32_0 = arith.constant 0 : i32
    return %arg0, %c0_i32 : i32, i32
  }
  func.func @transform_2(%arg0: i32) -> (i32, i32) {
    %c0_i32 = arith.constant 0 : i32
    %c0_i32_0 = arith.constant 0 : i32
    return %arg0, %c0_i32 : i32, i32
  }
}

</mosaic_0001>

<bundles_post_ra>
// kernel: tpu_custom_call.1
= control target key start
LH: loop header
LB: loop body
LE: loop exit
PB: predicated region body
PF: predicated region fallthrough
CT: control target
= control target key end

     0   :  { %s87_s0 = inlined_call_operand.vmem [shape: f32[8,64], index: 0, kind: input, shape index: {}]   ;;  %s88_s1 = inlined_call_operand.vmem [shape: f32[5000,32], index: 1, kind: input, shape index: {}]   ;;  %s89_s2 = inlined_call_operand.hbm [shape: f32[8,64], index: 2, kind: output, shape index: {}]  }
   0x1   :  { %v12_v0 = vld [vmem:[%s88_s1] sm:$0xff] }
   0x2   :  { %7 = vsyncpa [#allocation3], 0  ;;  %s61_s11 = smov 32   ;;  %vm17_vm0 = vcmask 261120   ;;  %v19_v1 = vld [vmem:[%s87_s0] sm:$0xff]  ;;  %s62_s14 = smov [#allocation2]  }
   0x3   :  { %14 = vrot.lane.b32.xlu0 %v12_v0, %s61_s11  ;;  %s29_s15 = sshll.u32 %s62_s14, 4  ;;  %vm21_vm1 = vcmask 523264   ;;  %s30_s15 = int_to_ptr.vmem [resolvable:$true] %s29_s15 }
   0x4   :  { %s39_s16 = scalar_lea.vmem %s30_s15, 128  ;;  %p44_p1 = scmp.lt.s32.totalorder %s30_s15, %s30_s15 }
   0x5   :  { %p40_p0 = scmp.ne.s32.totalorder %s30_s15, %s39_s16  ;;  %p45_p2 = scmp.lt.s32.totalorder %s39_s16, %s39_s16 }
   0x7   :  { %p46_p3 = por %p45_p2, %p44_p1 }
   0x9   :  { %p47_p4 = pnand %p46_p3, %p40_p0 }
  0x75   :  { %v15_v2 = vpop.permute.xlu0 %14 }
  0x76   :  { %v18_v3 = vsel %vm17_vm0, %v12_v0, %v15_v2 }
  0x77   :  { %v20_v4 = vadd.f32 %v19_v1, %v18_v3 }
  0x79   :  { %22 = vst.msk [vmem:[#allocation2] sm:$0xff] %vm21_vm1, %v20_v4 }
  0x7a   :  { %50 = shalt.err (!%p47_p4)
}
  0x7b   :  { %32 = dma.vmem_to_hbm [thread:$0]  %s30_s15, 128, %s89_s2, [#allocation3]  }
  0x7c   :  { %59 = dma.done.wait [#allocation3], 128  }
  0x7d   :  { %60 = vsyncadd [#allocation3], 4294967168 }
  0x7e   :  { %36 = vsyncpa [#allocation3], 1 }

</bundles_post_ra>
